<compile_context>
chip_gen: v5e
topology: v5e:2x2
jax: 0.10.0
libtpu: 0.0.40
codegen_flags: <defaults>
</compile_context>

<pallas_src>
import jax
import jax.numpy as jnp
from jax.experimental import pallas as pl
from jax.experimental.pallas import tpu as pltpu

ACG_LEN = 16  # synthetic; matches the global used in double-VAE.py


def acg_decoder_kernel(z_ref, w1_ref, b1_ref, w2m_ref, b2m_ref,
                       w2s_ref, b2s_ref, mean_ref, scale_ref):
    # Everything is "transposed": batch on the 128-lane axis, features on
    # sublanes -> fully packed vregs for all loads / VPU ops / stores.
    zT = z_ref[...]                                            # (d_latent, TB)
    h = jnp.dot(w1_ref[...], zT, preferred_element_type=jnp.float32)
    h = jnp.maximum(h + b1_ref[...], 0.0)                      # (hidden, TB)
    mean_ref[...] = (
        jnp.dot(w2m_ref[...], h, preferred_element_type=jnp.float32)
        + b2m_ref[...])                                        # (ACG_LEN, TB)
    scale_ref[...] = jnp.exp(
        jnp.dot(w2s_ref[...], h, preferred_element_type=jnp.float32)
        + b2s_ref[...])                                        # (ACG_LEN, TB)


def _round_up(x, m):
    return ((x + m - 1) // m) * m


def acg_decoder_forward(z, w1, b1, w2, b2, *, tb=None):
    """Returns (mean, scale) of the Normal distribution, each (B, 1, ACG_LEN)."""
    B = z.shape[0]
    z2 = z.reshape(B, -1).astype(jnp.float32)        # z.view(z.shape[0], -1)
    d_latent = z2.shape[1]
    hidden = w1.shape[1]
    out_dim = w2.shape[1]
    assert out_dim == 2 * ACG_LEN

    # Split the output projection into mean / log_sigma halves (trace-time, free)
    # so the kernel never slices sub-vreg lanes of a fused h2.
    w2m, w2s = w2[:, :ACG_LEN], w2[:, ACG_LEN:]
    b2m, b2s = b2[:, :ACG_LEN], b2[:, ACG_LEN:]

    # Transpose: batch -> lane axis (lane-dense outputs), features -> sublanes.
    zT = z2.T                                                       # (d_latent, B)
    w1T = jnp.asarray(w1, jnp.float32).T                            # (hidden, d_latent)
    b1T = jnp.asarray(b1, jnp.float32).reshape(1, hidden).T         # (hidden, 1)
    w2mT = jnp.asarray(w2m, jnp.float32).T                          # (ACG_LEN, hidden)
    w2sT = jnp.asarray(w2s, jnp.float32).T
    b2mT = jnp.asarray(b2m, jnp.float32).reshape(1, ACG_LEN).T      # (ACG_LEN, 1)
    b2sT = jnp.asarray(b2s, jnp.float32).reshape(1, ACG_LEN).T

    # Batch tile (lane axis): multiple of 128.  Feature dims are tiny, so even a
    # 2048-wide double-buffered tile uses < 1 MiB VMEM (safe on v5e/v6e/v7x).
    if tb is None:
        tb = _round_up(B, 128) if B <= 2048 else 1024
    tb = max(128, _round_up(tb, 128))
    Bp = _round_up(B, tb)
    if Bp != B:
        zT = jnp.pad(zT, ((0, 0), (0, Bp - B)))     # zero-pad batch columns
    grid = (Bp // tb,)

    batch_spec = lambda rows: pl.BlockSpec((rows, tb), lambda i: (0, i))
    const_spec = lambda shape: pl.BlockSpec(shape, lambda i: (0, 0))

    flops = 2 * Bp * hidden * (d_latent + 2 * ACG_LEN)
    bytes_accessed = 4 * (Bp * (d_latent + 2 * ACG_LEN)
                          + hidden * (d_latent + 1)
                          + 2 * ACG_LEN * (hidden + 1))

    meanT, scaleT = pl.pallas_call(
        acg_decoder_kernel,
        out_shape=(jax.ShapeDtypeStruct((ACG_LEN, Bp), jnp.float32),
                   jax.ShapeDtypeStruct((ACG_LEN, Bp), jnp.float32)),
        grid=grid,
        in_specs=[batch_spec(d_latent),              # zT tile     (d_latent, tb)
                  const_spec((hidden, d_latent)),    # W1^T
                  const_spec((hidden, 1)),           # b1^T
                  const_spec((ACG_LEN, hidden)),     # W2_mean^T
                  const_spec((ACG_LEN, 1)),          # b2_mean^T
                  const_spec((ACG_LEN, hidden)),     # W2_logsig^T
                  const_spec((ACG_LEN, 1))],         # b2_logsig^T
        out_specs=(batch_spec(ACG_LEN), batch_spec(ACG_LEN)),
        compiler_params=pltpu.CompilerParams(
            dimension_semantics=("parallel",)),
        cost_estimate=pl.CostEstimate(
            flops=flops,
            transcendentals=Bp * ACG_LEN,
            bytes_accessed=bytes_accessed),
    )(zT, w1T, b1T, w2mT, b2mT, w2sT, b2sT)

    # Drop batch padding, transpose back, then .reshape(-1, 1, ACG_LEN) as in
    # the PyTorch forward (pure XLA plumbing outside the kernel).
    mean = meanT[:, :B].T.reshape(-1, 1, ACG_LEN)
    scale = scaleT[:, :B].T.reshape(-1, 1, ACG_LEN)
    return mean, scale


def init_decoder_params(key, d_latent, hidden):
    """Deterministic synthetic parameters for the inner decoder MLP."""
    k1, k2, k3, k4 = jax.random.split(key, 4)
    w1 = (jax.random.normal(k1, (d_latent, hidden), jnp.float32) *
          (1.0 / jnp.sqrt(d_latent)))
    b1 = jax.random.normal(k2, (1, hidden), jnp.float32) * 0.01
    w2 = (jax.random.normal(k3, (hidden, 2 * ACG_LEN), jnp.float32) *
          (1.0 / jnp.sqrt(hidden)))
    b2 = jax.random.normal(k4, (1, 2 * ACG_LEN), jnp.float32) * 0.01
    return w1, b1, w2, b2


if __name__ == "__main__":
    B, d_latent, hidden = 2, 8, 32
    key = jax.random.PRNGKey(0)
    kz, kp = jax.random.split(key)
    # z may arrive with extra trailing dims; forward flattens with view(B, -1)
    z = jax.random.normal(kz, (B, d_latent), jnp.float32)
    w1, b1, w2, b2 = init_decoder_params(kp, d_latent, hidden)

    def reference(zz):
        h1 = jnp.maximum(zz.reshape(zz.shape[0], -1) @ w1 + b1, 0.0)
        h2 = h1 @ w2 + b2
        return (h2[:, :ACG_LEN].reshape(-1, 1, ACG_LEN),
                jnp.exp(h2[:, ACG_LEN:]).reshape(-1, 1, ACG_LEN))

    # Small-batch run (single grid step, padded to one 128-lane tile).
    mean, scale = acg_decoder_forward(z, w1, b1, w2, b2)
    jax.block_until_ready((mean, scale))
    mean_ref, scale_ref = reference(z)
    assert mean.shape == (B, 1, ACG_LEN) and scale.shape == (B, 1, ACG_LEN)
    assert jnp.allclose(mean, mean_ref, atol=1e-4, rtol=1e-4)
    assert jnp.allclose(scale, scale_ref, atol=1e-4, rtol=1e-4)

    # Larger batch exercising the multi-step pipelined ("parallel") grid.
    B2 = 300
    z_big = jax.random.normal(jax.random.PRNGKey(1), (B2, d_latent), jnp.float32)
    mean2, scale2 = acg_decoder_forward(z_big, w1, b1, w2, b2, tb=128)
    jax.block_until_ready((mean2, scale2))
    mean2_ref, scale2_ref = reference(z_big)
    assert mean2.shape == (B2, 1, ACG_LEN) and scale2.shape == (B2, 1, ACG_LEN)
    assert jnp.allclose(mean2, mean2_ref, atol=1e-4, rtol=1e-4)
    assert jnp.allclose(scale2, scale2_ref, atol=1e-4, rtol=1e-4)

    print("KERNEL_OK")
</pallas_src>

<mosaic_0001>
module attributes {stable_mosaic.version = 11 : i64} {
  func.func @acg_decoder_kernel(%arg0: i32, %arg1: memref<8x128xf32, #tpu.memory_space<vmem>>, %arg2: memref<32x8xf32, #tpu.memory_space<vmem>>, %arg3: memref<32x1xf32, #tpu.memory_space<vmem>>, %arg4: memref<16x32xf32, #tpu.memory_space<vmem>>, %arg5: memref<16x1xf32, #tpu.memory_space<vmem>>, %arg6: memref<16x32xf32, #tpu.memory_space<vmem>>, %arg7: memref<16x1xf32, #tpu.memory_space<vmem>>, %arg8: memref<16x128xf32, #tpu.memory_space<vmem>>, %arg9: memref<16x128xf32, #tpu.memory_space<vmem>>) attributes {dimension_semantics = [#tpu.dimension_semantics<parallel>], iteration_bounds = array<i64: 1>, scalar_prefetch = 0 : i64, scratch_operands = 0 : i64, tpu.core_type = #tpu.core_type<tc>, window_params = [{transform_indices = @transform_0, window_bounds = array<i64: 8, 128>}, {pipeline_mode = #tpu.pipeline_mode<synchronous>, transform_indices = @transform_1, window_bounds = array<i64: 32, 8>}, {pipeline_mode = #tpu.pipeline_mode<synchronous>, transform_indices = @transform_2, window_bounds = array<i64: 32, 1>}, {pipeline_mode = #tpu.pipeline_mode<synchronous>, transform_indices = @transform_3, window_bounds = array<i64: 16, 32>}, {pipeline_mode = #tpu.pipeline_mode<synchronous>, transform_indices = @transform_4, window_bounds = array<i64: 16, 1>}, {pipeline_mode = #tpu.pipeline_mode<synchronous>, transform_indices = @transform_5, window_bounds = array<i64: 16, 32>}, {pipeline_mode = #tpu.pipeline_mode<synchronous>, transform_indices = @transform_6, window_bounds = array<i64: 16, 1>}, {transform_indices = @transform_7, window_bounds = array<i64: 16, 128>}, {transform_indices = @transform_8, window_bounds = array<i64: 16, 128>}]} {
    %c0 = arith.constant 0 : index
    %c0_0 = arith.constant 0 : index
    %0 = vector.load %arg1[%c0, %c0_0] : memref<8x128xf32, #tpu.memory_space<vmem>>, vector<8x128xf32>
    %c0_1 = arith.constant 0 : index
    %c0_2 = arith.constant 0 : index
    %1 = vector.load %arg2[%c0_1, %c0_2] : memref<32x8xf32, #tpu.memory_space<vmem>>, vector<32x8xf32>
    %cst = arith.constant dense<0.000000e+00> : vector<32x128xf32>
    %2 = tpu.matmul %1, %0, %cst {dimension_numbers = #tpu.dot_dimension_numbers<[1], [0], [0], [1], [0, 0, 1, 1], [], []>} : vector<32x8xf32>, vector<8x128xf32>, vector<32x128xf32> -> vector<32x128xf32>
    %c0_3 = arith.constant 0 : index
    %c0_4 = arith.constant 0 : index
    %3 = vector.load %arg3[%c0_3, %c0_4] : memref<32x1xf32, #tpu.memory_space<vmem>>, vector<32x1xf32>
    %4 = vector.broadcast %3 : vector<32x1xf32> to vector<32x128xf32>
    %5 = arith.addf %2, %4 : vector<32x128xf32>
    %cst_5 = arith.constant 0.000000e+00 : f32
    %6 = vector.broadcast %cst_5 : f32 to vector<32x128xf32>
    %7 = arith.maximumf %5, %6 : vector<32x128xf32>
    %c0_6 = arith.constant 0 : index
    %c0_7 = arith.constant 0 : index
    %8 = vector.load %arg4[%c0_6, %c0_7] : memref<16x32xf32, #tpu.memory_space<vmem>>, vector<16x32xf32>
    %cst_8 = arith.constant dense<0.000000e+00> : vector<16x128xf32>
    %9 = tpu.matmul %8, %7, %cst_8 {dimension_numbers = #tpu.dot_dimension_numbers<[1], [0], [0], [1], [0, 0, 1, 1], [], []>} : vector<16x32xf32>, vector<32x128xf32>, vector<16x128xf32> -> vector<16x128xf32>
    %c0_9 = arith.constant 0 : index
    %c0_10 = arith.constant 0 : index
    %10 = vector.load %arg5[%c0_9, %c0_10] : memref<16x1xf32, #tpu.memory_space<vmem>>, vector<16x1xf32>
    %11 = vector.broadcast %10 : vector<16x1xf32> to vector<16x128xf32>
    %12 = arith.addf %9, %11 : vector<16x128xf32>
    %c0_11 = arith.constant 0 : index
    %c0_12 = arith.constant 0 : index
    %13 = vector.load %arg8[%c0_11, %c0_12] : memref<16x128xf32, #tpu.memory_space<vmem>>, vector<16x128xf32>
    tpu.vector_store %arg8[%c0_11, %c0_12], %12 {strides = array<i32>} : memref<16x128xf32, #tpu.memory_space<vmem>>, vector<16x128xf32>,
    %c0_13 = arith.constant 0 : index
    %c0_14 = arith.constant 0 : index
    %14 = vector.load %arg6[%c0_13, %c0_14] : memref<16x32xf32, #tpu.memory_space<vmem>>, vector<16x32xf32>
    %cst_15 = arith.constant dense<0.000000e+00> : vector<16x128xf32>
    %15 = tpu.matmul %14, %7, %cst_15 {dimension_numbers = #tpu.dot_dimension_numbers<[1], [0], [0], [1], [0, 0, 1, 1], [], []>} : vector<16x32xf32>, vector<32x128xf32>, vector<16x128xf32> -> vector<16x128xf32>
    %c0_16 = arith.constant 0 : index
    %c0_17 = arith.constant 0 : index
    %16 = vector.load %arg7[%c0_16, %c0_17] : memref<16x1xf32, #tpu.memory_space<vmem>>, vector<16x1xf32>
    %17 = vector.broadcast %16 : vector<16x1xf32> to vector<16x128xf32>
    %18 = arith.addf %15, %17 : vector<16x128xf32>
    %19 = math.exp %18 : vector<16x128xf32>
    %c0_18 = arith.constant 0 : index
    %c0_19 = arith.constant 0 : index
    %20 = vector.load %arg9[%c0_18, %c0_19] : memref<16x128xf32, #tpu.memory_space<vmem>>, vector<16x128xf32>
    tpu.vector_store %arg9[%c0_18, %c0_19], %19 {strides = array<i32>} : memref<16x128xf32, #tpu.memory_space<vmem>>, vector<16x128xf32>,
    return
  }
  func.func @transform_0(%arg0: i32) -> (i32, i32) {
    %c0_i32 = arith.constant 0 : i32
    %c0_i32_0 = arith.constant 0 : i32
    return %c0_i32, %arg0 : i32, i32
  }
  func.func @transform_1(%arg0: i32) -> (i32, i32) {
    %c0_i32 = arith.constant 0 : i32
    %c0_i32_0 = arith.constant 0 : i32
    %c0_i32_1 = arith.constant 0 : i32
    return %c0_i32, %c0_i32_0 : i32, i32
  }
  func.func @transform_2(%arg0: i32) -> (i32, i32) {
    %c0_i32 = arith.constant 0 : i32
    %c0_i32_0 = arith.constant 0 : i32
    %c0_i32_1 = arith.constant 0 : i32
    return %c0_i32, %c0_i32_0 : i32, i32
  }
  func.func @transform_3(%arg0: i32) -> (i32, i32) {
    %c0_i32 = arith.constant 0 : i32
    %c0_i32_0 = arith.constant 0 : i32
    %c0_i32_1 = arith.constant 0 : i32
    return %c0_i32, %c0_i32_0 : i32, i32
  }
  func.func @transform_4(%arg0: i32) -> (i32, i32) {
    %c0_i32 = arith.constant 0 : i32
    %c0_i32_0 = arith.constant 0 : i32
    %c0_i32_1 = arith.constant 0 : i32
    return %c0_i32, %c0_i32_0 : i32, i32
  }
  func.func @transform_5(%arg0: i32) -> (i32, i32) {
    %c0_i32 = arith.constant 0 : i32
    %c0_i32_0 = arith.constant 0 : i32
    %c0_i32_1 = arith.constant 0 : i32
    return %c0_i32, %c0_i32_0 : i32, i32
  }
  func.func @transform_6(%arg0: i32) -> (i32, i32) {
    %c0_i32 = arith.constant 0 : i32
    %c0_i32_0 = arith.constant 0 : i32
    %c0_i32_1 = arith.constant 0 : i32
    return %c0_i32, %c0_i32_0 : i32, i32
  }
  func.func @transform_7(%arg0: i32) -> (i32, i32) {
    %c0_i32 = arith.constant 0 : i32
    %c0_i32_0 = arith.constant 0 : i32
    return %c0_i32, %arg0 : i32, i32
  }
  func.func @transform_8(%arg0: i32) -> (i32, i32) {
    %c0_i32 = arith.constant 0 : i32
    %c0_i32_0 = arith.constant 0 : i32
    return %c0_i32, %arg0 : i32, i32
  }
}

</mosaic_0001>

<bundles_post_ra>
// kernel: tpu_custom_call.1
= control target key start
LH: loop header
LB: loop body
LE: loop exit
PB: predicated region body
PF: predicated region fallthrough
CT: control target
= control target key end

     0   :  { %14 = vsyncpa [#allocation3], 0  ;;  %vm59_vm0 = vcmask 64512   ;;  %v309_v2 = vmov 0   ;;  %s420_s0 = inlined_call_operand.vmem [shape: f32[8,128], index: 0, kind: input, shape index: {}]   ;;  %s421_s1 = inlined_call_operand.vmem [shape: f32[32,8], index: 1, kind: input, shape index: {}]   ;;  %s422_s2 = inlined_call_operand.vmem [shape: f32[32,1], index: 2, kind: input, shape index: {}]   ;;  %s423_s3 = inlined_call_operand.vmem [shape: f32[16,32], index: 3, kind: input, shape index: {}]   ;;  %s424_s4 = inlined_call_operand.vmem [shape: f32[16,1], index: 4, kind: input, shape index: {}]   ;;  %s425_s5 = inlined_call_operand.vmem [shape: f32[16,32], index: 5, kind: input, shape index: {}]   ;;  %s426_s6 = inlined_call_operand.vmem [shape: f32[16,1], index: 6, kind: input, shape index: {}]   ;;  %s427_s7 = inlined_call_operand.hbm [shape: f32[16,128], index: 7, kind: output, shape index: {0}]   ;;  %s428_s8 = inlined_call_operand.hbm [shape: f32[16,128], index: 8, kind: output, shape index: {1}]  }
   0x1   :  { %v30_v0 = vld [vmem:[%s420_s0] sm:$0xff]  ;;  %v32_v1 = vld [vmem:[%s421_s1 + $0x8] sm:$0xff]  ;;  %250 = vset.pattern.permute.xlu0 %v309_v2  ;;  %v38_v3 = vld [vmem:[%s422_s2 + $0x18] sm:$0xff]  ;;  %251 = vset.pattern.permute.xlu1 %v309_v2 }
   0x2   :  { %244 = vmatpush.msra.mxu3 %v30_v0  ;;  %v36_v4 = vld [vmem:[%s422_s2 + $0x8] sm:$0xff]  ;;  %56 = vperm.xlu0 %250, %v38_v3   ;;  %v31_v5 = vld [vmem:[%s421_s1] sm:$0xff] }
   0x3   :  { %237 = vmatmul.msk.f32.vlgmr.msra.gmra.mxu3 %vm59_vm0, %v32_v1  ;;  %87 = vmatpush.msra.mxu0 %v30_v0 }
   0x4   :  { %15 = vsyncpa [#allocation5], 0  ;;  %46 = vperm.xlu1 %251, %v36_v4   ;;  %236 = vmatmul.msk.f32.vlgmr.msra.gmra.mxu0 %vm59_vm0, %v31_v5  ;;  %v33_v6 = vld [vmem:[%s421_s1 + $0x10] sm:$0xff]  ;;  %v35_v8 = vld [vmem:[%s422_s2] sm:$0xff]  ;;  %vm119_vm1 = vcmask 261120   ;;  %s310_s12 = smov [#allocation2]  }
   0x5   :  { %252 = vset.pattern.permute.xlu2 %v309_v2  ;;  %v37_v7 = vld [vmem:[%s422_s2 + $0x10] sm:$0xff]  ;;  %v34_v9 = vld [vmem:[%s421_s1 + $0x18] sm:$0xff]  ;;  %v107_v10 = vld [vmem:[%s424_s4] sm:$0xff]  ;;  %s204_s0 = sshll.u32 %s310_s12, 4  ;;  %s206_s15 = sshll.u32 %s427_s7, 4  ;;  %s205_s0 = int_to_ptr.vmem [resolvable:$true] %s204_s0  ;;  %s207_s15 = int_to_ptr.hbm [resolvable:$true] %s206_s15 }
   0x6   :  { %v108_v11 = vld [vmem:[%s424_s4 + $0x8] sm:$0xff]  ;;  %v153_v13 = vld [vmem:[%s426_s6] sm:$0xff]  ;;  %s313_s7 = smov [#allocation4]   ;;  %s219_s19 = sshll.u32 %s428_s8, 4  ;;  %s220_s19 = int_to_ptr.hbm [resolvable:$true] %s219_s19 }
   0x7   :  { %157 = vperm.xlu2 %252, %v153_v13   ;;  %v154_v17 = vld [vmem:[%s426_s6 + $0x8] sm:$0xff]  ;;  %v105_v30 = vld [vmem:[%s423_s3] sm:$0xff]  ;;  %s217_s16 = sshll.u32 %s313_s7, 4  ;;  %s218_s16 = int_to_ptr.vmem [resolvable:$true] %s217_s16 }
   0x8   :  { %v151_v31 = vld [vmem:[%s425_s5] sm:$0xff]  ;;  %v106_v32 = vld [vmem:[%s423_s3 + $0x8] sm:$0xff]  ;;  %s311_s3 = smov 128  }
   0x9   :  { %v152_v33 = vld [vmem:[%s425_s5 + $0x8] sm:$0xff]  ;;  %s312_s5 = smov 8  }
   0xa   :  { %51 = vperm.xlu0 %250, %v37_v7  }
   0xb   :  { %238 = vmatmul.msk.f32.gmra.mxu3 %vm59_vm0, %v33_v6 }
   0xc   :  { %41 = vperm.xlu1 %251, %v35_v8  }
   0xf   :  { %162 = vperm.xlu2 %252, %v154_v17  }
  0x12   :  { %111 = vperm.xlu0 %250, %v107_v10  }
  0x13   :  { %239 = vmatmul.msk.f32.gmra.mxu3 %vm59_vm0, %v34_v9 }
  0x14   :  { %116 = vperm.xlu1 %251, %v108_v11  }
  0x61   :  { %v158_v37 = vpop.permute.xlu2 %157 }
  0x69   :  { %v163_v44 = vpop.permute.xlu2 %162 }
  0x74   :  { %v57_v14 = vpop.permute.xlu0 %56 }
  0x76   :  { %v47_v16 = vpop.permute.xlu1 %46 }
  0x7c   :  { %v52_v18 = vpop.permute.xlu0 %51 }
  0x7e   :  { %v42_v25 = vpop.permute.xlu1 %41 }
  0x81   :  { %v89_v22 = vpop.f32.mrf.mxu0 }
  0x82   :  { %v90_v27 = vadd.f32 %v89_v22, %v42_v25 }
  0x84   :  { %v101_v29 = vmax.f32 %v90_v27, 0.0  ;;  %v112_v34 = vpop.permute.xlu0 %111 }
  0x86   :  { %v92_v12 = vpop.f32.mrf.mxu3  ;;  %v117_v40 = vpop.permute.xlu1 %116 }
  0x87   :  { %v93_v23 = vadd.f32 %v92_v12, %v47_v16 }
  0x89   :  { %v102_v28 = vmax.f32 %v93_v23, 0.0 }
  0x8e   :  { %v95_v15 = vpop.f32.mrf.mxu3 }
  0x8f   :  { %v96_v20 = vadd.f32 %v95_v15, %v52_v18 }
  0x91   :  { %v103_v26 = vmax.f32 %v96_v20, 0.0 }
  0x96   :  { %v98_v19 = vpop.f32.mrf.mxu3 }
  0x97   :  { %v99_v21 = vadd.f32 %v98_v19, %v57_v14 }
  0x99   :  { %v104_v24 = vmax.f32 %v99_v21, 0.0 }
  0x9b   :  { %138 = vmatpush.msra.mxu1 %v104_v24  ;;  %183 = vmatpush.msra.mxu2 %v104_v24 }
  0x9d   :  { %139 = vmatpush.msra.mxu1 %v103_v26  ;;  %184 = vmatpush.msra.mxu2 %v103_v26 }
  0x9f   :  { %140 = vmatpush.msra.mxu1 %v102_v28  ;;  %185 = vmatpush.msra.mxu2 %v102_v28 }
  0xa1   :  { %141 = vmatpush.msra.mxu1 %v101_v29  ;;  %186 = vmatpush.msra.mxu2 %v101_v29 }
  0xa2   :  { %240 = vmatmul.msk.f32.vlgmr.msra.gmra.mxu1 %vm119_vm1, %v105_v30  ;;  %242 = vmatmul.msk.f32.vlgmr.msra.gmra.mxu2 %vm119_vm1, %v151_v31 }
  0xaa   :  { %241 = vmatmul.msk.f32.gmra.mxu1 %vm119_vm1, %v106_v32  ;;  %243 = vmatmul.msk.f32.gmra.mxu2 %vm119_vm1, %v152_v33 }
 0x11f   :  { %v143_v35 = vpop.f32.mrf.mxu1 }
 0x120   :  { %v144_v36 = vadd.f32 %v143_v35, %v112_v34 }
 0x122   :  { %149 = vst [vmem:[#allocation2] sm:$0xff] %v144_v36 }
 0x125   :  { %v188_v38 = vpop.f32.mrf.mxu2 }
 0x126   :  { %v189_v39 = vadd.f32 %v188_v38, %v158_v37 }
 0x127   :  { %v146_v41 = vpop.f32.mrf.mxu1 }
 0x128   :  { %v194_v42 = vmul.f32 1.442695, %v189_v39  ;;  %v147_v43 = vadd.f32 %v146_v41, %v117_v40 }
 0x12a   :  { %253 = vpow2.f32 %v194_v42  ;;  %150 = vst [vmem:[#allocation2 + $0x8] sm:$0xff] %v147_v43 }
 0x12b   :  { %212 = dma.vmem_to_hbm [thread:$0]  %s205_s0, 256, %s207_s15, [#allocation3], %s311_s3, %s311_s3, %s312_s5  }
 0x12d   :  { %v191_v45 = vpop.f32.mrf.mxu2 }
 0x12e   :  { %v192_v46 = vadd.f32 %v191_v45, %v163_v44 }
 0x130   :  { %v254_v47 = vpop.eup %253  ;;  %v196_v48 = vmul.f32 1.442695, %v192_v46 }
 0x131   :  { %198 = vst [vmem:[#allocation4] sm:$0xff] %v254_v47 }
 0x132   :  { %255 = vpow2.f32 %v196_v48 }
 0x138   :  { %v256_v49 = vpop.eup %255 }
 0x139   :  { %199 = vst [vmem:[#allocation4 + $0x8] sm:$0xff] %v256_v49 }
 0x13a   :  { %225 = dma.vmem_to_hbm [thread:$0]  %s218_s16, 256, %s220_s19, [#allocation5], %s311_s3, %s311_s3, %s312_s5  }
 0x13b   :  { %305 = dma.done.wait [#allocation3], 256  }
 0x13c   :  { %306 = vsyncadd [#allocation3], 4294967040 }
 0x13d   :  { %307 = dma.done.wait [#allocation5], 256  }
 0x13e   :  { %308 = vsyncadd [#allocation5], 4294967040 }
 0x13f   :  { %234 = vsyncpa [#allocation3], 1 }
 0x140   :  { %235 = vsyncpa [#allocation5], 1 }

</bundles_post_ra>
